<compile_context>
chip_gen: v6e
topology: v6e:2x2x1
jax: 0.10.0
libtpu: 0.0.40
codegen_flags: <defaults>
</compile_context>

<pallas_src>
import functools

import jax
import jax.numpy as jnp
from jax.experimental import pallas as pl
from jax.experimental.pallas import tpu as pltpu

IN_F = 13
HID = 96
HID_PAD = 128          # hidden padded to full lane width (zero pad; bit-exact)
OUT_F = 2
TILE_B_DEFAULT = 4096  # batch lanes per grid step (multiple of 128)


def mlp_kernel(xT_ref, w1T_ref, b1_ref, w2d_ref, db_ref, oT_ref):
    # fc1 (+ReLU): single-pass bf16 MXU matmul, f32 accumulation.
    xT = xT_ref[...].astype(jnp.bfloat16)                      # (13, tb)
    hT = jnp.dot(w1T_ref[...], xT,
                 preferred_element_type=jnp.float32)           # (128, tb)
    hT = jnp.maximum(hT + b1_ref[...], 0.0)                    # bias + ReLU
    # fc2 reduced to the single needed scalar per row, off the MXU:
    #   d = logit1 - logit0  (VPU multiply + sublane reduce + scalar bias diff)
    d = jnp.sum(hT * w2d_ref[...], axis=0, keepdims=True) + db_ref[0, 0]  # (1, tb)
    # Exact 2-class log_softmax:  out0 = -softplus(d), out1 = d - softplus(d).
    # (log(1+x) kept instead of log1p: difference is << tolerance and avoids
    #  relying on a log1p lowering.)
    sp = jnp.maximum(d, 0.0) + jnp.log(1.0 + jnp.exp(-jnp.abs(d)))        # (1, tb)
    oT_ref[0:1, :] = -sp          # log p(class 0)
    oT_ref[1:2, :] = d - sp       # log p(class 1)


def _round_up(n, m):
    return ((n + m - 1) // m) * m


@functools.partial(jax.jit, static_argnames=("tile_b",))
def net_forward(x, w1T, b1p, w2diff, db, *, tile_b=TILE_B_DEFAULT):
    """x: (B, 13) f32  ->  (B, 2) f32 log-probabilities. Params from pad_params()."""
    B = x.shape[0]
    # tb is a lane count -> multiple of 128.  Cap it so B > one tile still gives
    # >= 2 grid steps ("parallel" axis shards across v7x's 2 TensorCores).
    tb = min(_round_up(tile_b, 128), max(128, _round_up((B + 1) // 2, 128)))
    Bp = _round_up(B, tb)
    xT = jnp.transpose(x)                                   # (13, B): batch -> lanes
    if Bp != B:
        xT = jnp.pad(xT, ((0, 0), (0, Bp - B)))             # zero rows: finite, dropped
    grid = (Bp // tb,)

    weight_bytes = IN_F * HID_PAD * 2 + HID_PAD * 4 * 2 + 4
    cost = pl.CostEstimate(
        flops=2 * Bp * IN_F * HID_PAD + 3 * Bp * HID_PAD,
        transcendentals=2 * Bp,
        bytes_accessed=Bp * IN_F * 4 + Bp * OUT_F * 4 + weight_bytes,
    )

    outT = pl.pallas_call(
        mlp_kernel,
        out_shape=jax.ShapeDtypeStruct((OUT_F, Bp), jnp.float32),
        grid_spec=pltpu.PrefetchScalarGridSpec(
            num_scalar_prefetch=0,
            grid=grid,
            in_specs=[
                pl.BlockSpec((IN_F, tb), lambda i: (0, i)),          # xT: tiled on lanes
                pl.BlockSpec((HID_PAD, IN_F), lambda i: (0, 0)),     # w1T: resident (bf16)
                pl.BlockSpec((HID_PAD, 1), lambda i: (0, 0)),        # b1: resident
                pl.BlockSpec((HID_PAD, 1), lambda i: (0, 0)),        # w2diff: resident
                pl.BlockSpec(memory_space=pltpu.MemorySpace.SMEM),   # db scalar
            ],
            out_specs=pl.BlockSpec((OUT_F, tb), lambda i: (0, i)),   # lane-dense output
        ),
        compiler_params=pltpu.CompilerParams(
            dimension_semantics=("parallel",),
            vmem_limit_bytes=32 * 1024 * 1024,
        ),
        cost_estimate=cost,
    )(xT, w1T, b1p, w2diff, db)
    return jnp.transpose(outT)[:B]                           # (B, 2)


def init_params(key):
    """nn.Linear-style init (U[-1/sqrt(fan_in), 1/sqrt(fan_in)]), x @ W + b convention."""
    k1, k2, k3, k4 = jax.random.split(key, 4)
    lim1 = 1.0 / jnp.sqrt(float(IN_F))
    lim2 = 1.0 / jnp.sqrt(float(HID))
    w1 = jax.random.uniform(k1, (IN_F, HID), jnp.float32, -lim1, lim1)
    b1 = jax.random.uniform(k2, (1, HID), jnp.float32, -lim1, lim1)
    w2 = jax.random.uniform(k3, (HID, OUT_F), jnp.float32, -lim2, lim2)
    b2 = jax.random.uniform(k4, (1, OUT_F), jnp.float32, -lim2, lim2)
    return w1, b1, w2, b2


def pad_params(w1, b1, w2, b2):
    """One-time preprocessing for the kernel.

    Returns:
      w1T    (128, 13) bf16 : fc1 weight, transposed, hidden zero-padded 96->128
      b1p    (128, 1)  f32  : fc1 bias, padded
      w2diff (128, 1)  f32  : w2[:, 1] - w2[:, 0], padded
      db     (1, 1)    f32  : b2[0, 1] - b2[0, 0]
    """
    w1T = jnp.zeros((HID_PAD, IN_F), jnp.float32).at[:HID, :].set(w1.T)
    w1T = w1T.astype(jnp.bfloat16)
    b1p = jnp.zeros((HID_PAD, 1), jnp.float32).at[:HID, 0].set(b1[0])
    w2diff = jnp.zeros((HID_PAD, 1), jnp.float32).at[:HID, 0].set(w2[:, 1] - w2[:, 0])
    db = (b2[:, 1:2] - b2[:, 0:1]).astype(jnp.float32)
    return w1T, b1p, w2diff, db


def _reference(x, w1, b1, w2, b2, *, bf16_fc1=False):
    xw, w1r = (x, w1)
    if bf16_fc1:
        xw, w1r = x.astype(jnp.bfloat16), w1.astype(jnp.bfloat16)
    h = jnp.maximum(jnp.dot(xw, w1r, preferred_element_type=jnp.float32) + b1, 0.0)
    return jax.nn.log_softmax(h @ w2 + b2, axis=-1)


if __name__ == "__main__":
    key = jax.random.PRNGKey(0)
    kx1, kx2, kp = jax.random.split(key, 3)
    w1, b1, w2, b2 = init_params(kp)
    params = pad_params(w1, b1, w2, b2)

    # Case 1: small batch -> single 128-lane tile (rows padded 8 -> 128).
    B1 = 8
    x1 = jax.random.normal(kx1, (B1, IN_F), jnp.float32)
    out1 = jax.block_until_ready(net_forward(x1, *params))
    assert out1.shape == (B1, OUT_F)
    assert jnp.allclose(out1, _reference(x1, w1, b1, w2, b2, bf16_fc1=True),
                        atol=1e-4), "mismatch vs bf16-fc1 reference (B=8)"
    assert jnp.allclose(out1, _reference(x1, w1, b1, w2, b2),
                        atol=1e-1), "mismatch vs f32 reference (B=8)"

    # Case 2: batch not a multiple of the tile -> multi-step grid + lane padding.
    B2 = 300
    x2 = jax.random.normal(kx2, (B2, IN_F), jnp.float32)
    out2 = jax.block_until_ready(net_forward(x2, *params, tile_b=128))
    assert out2.shape == (B2, OUT_F)
    assert jnp.allclose(out2, _reference(x2, w1, b1, w2, b2, bf16_fc1=True),
                        atol=1e-4), "mismatch vs bf16-fc1 reference (B=300)"

    print("KERNEL_OK")
</pallas_src>

<mosaic_0001>
module attributes {stable_mosaic.version = 11 : i64} {
  func.func @mlp_kernel(%arg0: i32, %arg1: memref<13x128xf32, #tpu.memory_space<vmem>>, %arg2: memref<128x13xbf16, #tpu.memory_space<vmem>>, %arg3: memref<128x1xf32, #tpu.memory_space<vmem>>, %arg4: memref<128x1xf32, #tpu.memory_space<vmem>>, %arg5: memref<1x1xf32, #tpu.memory_space<smem>>, %arg6: memref<2x128xf32, #tpu.memory_space<vmem>>) attributes {dimension_semantics = [#tpu.dimension_semantics<parallel>], iteration_bounds = array<i64: 1>, scalar_prefetch = 0 : i64, scratch_operands = 0 : i64, tpu.core_type = #tpu.core_type<tc>, window_params = [{transform_indices = @transform_0, window_bounds = array<i64: 13, 128>}, {pipeline_mode = #tpu.pipeline_mode<synchronous>, transform_indices = @transform_1, window_bounds = array<i64: 128, 13>}, {pipeline_mode = #tpu.pipeline_mode<synchronous>, transform_indices = @transform_2, window_bounds = array<i64: 128, 1>}, {pipeline_mode = #tpu.pipeline_mode<synchronous>, transform_indices = @transform_3, window_bounds = array<i64: 128, 1>}, {transform_indices = @transform_4, window_bounds = array<i64: 1, 1>}, {transform_indices = @transform_5, window_bounds = array<i64: 2, 128>}]} {
    %c0 = arith.constant 0 : index
    %c0_0 = arith.constant 0 : index
    %0 = vector.load %arg1[%c0, %c0_0] : memref<13x128xf32, #tpu.memory_space<vmem>>, vector<13x128xf32>
    %1 = arith.truncf %0 : vector<13x128xf32> to vector<13x128xbf16>
    %c0_1 = arith.constant 0 : index
    %c0_2 = arith.constant 0 : index
    %2 = vector.load %arg2[%c0_1, %c0_2] : memref<128x13xbf16, #tpu.memory_space<vmem>>, vector<128x13xbf16>
    %cst = arith.constant dense<0.000000e+00> : vector<128x128xf32>
    %3 = tpu.matmul %2, %1, %cst {dimension_numbers = #tpu.dot_dimension_numbers<[1], [0], [0], [1], [0, 0, 1, 1], [], []>} : vector<128x13xbf16>, vector<13x128xbf16>, vector<128x128xf32> -> vector<128x128xf32>
    %c0_3 = arith.constant 0 : index
    %c0_4 = arith.constant 0 : index
    %4 = vector.load %arg3[%c0_3, %c0_4] : memref<128x1xf32, #tpu.memory_space<vmem>>, vector<128x1xf32>
    %5 = vector.broadcast %4 : vector<128x1xf32> to vector<128x128xf32>
    %6 = arith.addf %3, %5 : vector<128x128xf32>
    %cst_5 = arith.constant 0.000000e+00 : f32
    %7 = vector.broadcast %cst_5 : f32 to vector<128x128xf32>
    %8 = arith.maximumf %6, %7 : vector<128x128xf32>
    %c0_6 = arith.constant 0 : index
    %c0_7 = arith.constant 0 : index
    %9 = vector.load %arg4[%c0_6, %c0_7] : memref<128x1xf32, #tpu.memory_space<vmem>>, vector<128x1xf32>
    %10 = vector.broadcast %9 : vector<128x1xf32> to vector<128x128xf32>
    %11 = arith.mulf %8, %10 : vector<128x128xf32>
    %cst_8 = arith.constant dense<0.000000e+00> : vector<128xf32>
    %12 = vector.multi_reduction <add>, %11, %cst_8 [0] : vector<128x128xf32> to vector<128xf32>
    %13 = vector.shape_cast %12 : vector<128xf32> to vector<1x128xf32>
    %c0_9 = arith.constant 0 : index
    %c0_10 = arith.constant 0 : index
    %14 = memref.load %arg5[%c0_9, %c0_10] : memref<1x1xf32, #tpu.memory_space<smem>>
    %15 = vector.broadcast %14 : f32 to vector<1x128xf32>
    %16 = arith.addf %13, %15 : vector<1x128xf32>
    %cst_11 = arith.constant 0.000000e+00 : f32
    %17 = vector.broadcast %cst_11 : f32 to vector<1x128xf32>
    %18 = arith.maximumf %16, %17 : vector<1x128xf32>
    %19 = math.absf %16 : vector<1x128xf32>
    %cst_12 = arith.constant 0.000000e+00 : f32
    %20 = vector.broadcast %cst_12 : f32 to vector<1x128xf32>
    %21 = arith.subf %20, %19 : vector<1x128xf32>
    %22 = math.exp %21 : vector<1x128xf32>
    %cst_13 = arith.constant 1.000000e+00 : f32
    %23 = vector.broadcast %cst_13 : f32 to vector<1x128xf32>
    %24 = arith.addf %23, %22 : vector<1x128xf32>
    %25 = math.log %24 : vector<1x128xf32>
    %26 = arith.addf %18, %25 : vector<1x128xf32>
    %cst_14 = arith.constant 0.000000e+00 : f32
    %27 = vector.broadcast %cst_14 : f32 to vector<1x128xf32>
    %28 = arith.subf %27, %26 : vector<1x128xf32>
    %c0_15 = arith.constant 0 : index
    %c0_16 = arith.constant 0 : index
    %29 = vector.load %arg6[%c0_15, %c0_16] : memref<2x128xf32, #tpu.memory_space<vmem>>, vector<1x128xf32>
    tpu.vector_store %arg6[%c0_15, %c0_16], %28 {strides = array<i32>} : memref<2x128xf32, #tpu.memory_space<vmem>>, vector<1x128xf32>,
    %30 = arith.subf %16, %26 : vector<1x128xf32>
    %c1 = arith.constant 1 : index
    %c0_17 = arith.constant 0 : index
    %31 = vector.load %arg6[%c1, %c0_17] : memref<2x128xf32, #tpu.memory_space<vmem>>, vector<1x128xf32>
    tpu.vector_store %arg6[%c1, %c0_17], %30 {strides = array<i32>} : memref<2x128xf32, #tpu.memory_space<vmem>>, vector<1x128xf32>,
    return
  }
  func.func @transform_0(%arg0: i32) -> (i32, i32) {
    %c0_i32 = arith.constant 0 : i32
    %c0_i32_0 = arith.constant 0 : i32
    return %c0_i32, %arg0 : i32, i32
  }
  func.func @transform_1(%arg0: i32) -> (i32, i32) {
    %c0_i32 = arith.constant 0 : i32
    %c0_i32_0 = arith.constant 0 : i32
    %c0_i32_1 = arith.constant 0 : i32
    return %c0_i32, %c0_i32_0 : i32, i32
  }
  func.func @transform_2(%arg0: i32) -> (i32, i32) {
    %c0_i32 = arith.constant 0 : i32
    %c0_i32_0 = arith.constant 0 : i32
    %c0_i32_1 = arith.constant 0 : i32
    return %c0_i32, %c0_i32_0 : i32, i32
  }
  func.func @transform_3(%arg0: i32) -> (i32, i32) {
    %c0_i32 = arith.constant 0 : i32
    %c0_i32_0 = arith.constant 0 : i32
    %c0_i32_1 = arith.constant 0 : i32
    return %c0_i32, %c0_i32_0 : i32, i32
  }
  func.func @transform_4(%arg0: i32) -> (i32, i32) {
    %c0_i32 = arith.constant 0 : i32
    %c0_i32_0 = arith.constant 0 : i32
    %c0_i32_1 = arith.constant 0 : i32
    return %c0_i32, %c0_i32_0 : i32, i32
  }
  func.func @transform_5(%arg0: i32) -> (i32, i32) {
    %c0_i32 = arith.constant 0 : i32
    %c0_i32_0 = arith.constant 0 : i32
    return %c0_i32, %arg0 : i32, i32
  }
}

</mosaic_0001>

<bundles_post_ra>
// kernel: net_forward.1
= control target key start
LH: loop header
LB: loop body
LE: loop exit
PB: predicated region body
PF: predicated region fallthrough
CT: control target
= control target key end

     0   :  { %vm203_vm0 = vcmask 1045504   ;;  %vm204_vm1 = vcmask 1046528   ;;  %v570_v3 = vmov 0   ;;  %vm178_vm2 = vcmask 105472   ;;  %s743_s0 = inlined_call_operand.vmem [shape: f32[13,128], index: 0, kind: input, shape index: {}]   ;;  %s744_s1 = inlined_call_operand.vmem [shape: bf16[128,13], index: 1, kind: input, shape index: {}]   ;;  %s745_s2 = inlined_call_operand.vmem [shape: f32[128,1], index: 2, kind: input, shape index: {}]   ;;  %s746_s3 = inlined_call_operand.vmem [shape: f32[128,1], index: 3, kind: input, shape index: {}]   ;;  %s747_s4 = inlined_call_operand.<no memory space> [shape: f32[1,1], index: 4, kind: input, shape index: {}]   ;;  %s748_s5 = inlined_call_operand.hbm [shape: f32[2,128], index: 5, kind: output, shape index: {}]  }
   0x1   :  { %v44_v0 = vld [vmem:[%s745_s2 + $0x10] sm:$0xff]  ;;  %v42_v1 = vld [vmem:[%s745_s2] sm:$0xff]  ;;  %535 = vset.pattern.permute.xlu1 %v570_v3  ;;  %534 = vset.pattern.permute.xlu0 %v570_v3  ;;  %v24_v4 = vld [vmem:[%s743_s0 + $0x8] sm:$0x1f]  ;;  %v571_v6 = vmov 65535  }
   0x2   :  { %v23_v2 = vld [vmem:[%s743_s0] sm:$0xff]  ;;  %70 = vperm.xlu1 %535, %v44_v0   ;;  %60 = vperm.xlu0 %534, %v42_v1   ;;  %v205_v7 = vsel %vm203_vm0, 4294967295, %v571_v6  ;;  %v45_v8 = vld [vmem:[%s745_s2 + $0x18] sm:$0xff]  ;;  %v43_v13 = vld [vmem:[%s745_s2 + $0x8] sm:$0xff] }
   0x3   :  { %v25_v5 = vpack.c.bf16 %v24_v4, %v23_v2  ;;  %v536_v9 = vld [vmem:[%s744_s1] sm:$0xff]   ;;  %v206_v10 = vsel %vm204_vm1, %v205_v7, 0  ;;  %v538_v14 = vld [vmem:[%s744_s1 + $0x8] sm:$0xff]   ;;  %v540_v18 = vld [vmem:[%s744_s1 + $0x10] sm:$0xff]  }
   0x4   :  { %v537_v11 = vld [vmem:[%s744_s1 + $0x20] sm:$0xff]   ;;  %513 = vmatprep.mubr.msk.bf16.mxu0 %vm178_vm2, %v536_v9  ;;  %v539_v15 = vld [vmem:[%s744_s1 + $0x28] sm:$0xff]   ;;  %v541_v19 = vld [vmem:[%s744_s1 + $0x30] sm:$0xff]  }
   0x5   :  { %v208_v12 = vand.u32 %v206_v10, %v25_v5  ;;  %521 = vmatprep.mubr.msk.bf16.mxu1 %vm178_vm2, %v537_v11  ;;  %v324_v16 = vld [vmem:[%s746_s3 + $0x8] sm:$0xff]  ;;  %v323_v17 = vld [vmem:[%s746_s3] sm:$0xff]  ;;  %v325_v20 = vld [vmem:[%s746_s3 + $0x10] sm:$0xff] }
   0x6   :  { %75 = vperm.xlu1 %535, %v45_v8   ;;  %65 = vperm.xlu0 %534, %v43_v13   ;;  %v46_v21 = vld [vmem:[%s745_s2 + $0x20] sm:$0xff]  ;;  %v542_v22 = vld [vmem:[%s744_s1 + $0x18] sm:$0xff]   ;;  %v47_v25 = vld [vmem:[%s745_s2 + $0x28] sm:$0xff] }
   0x7   :  { %511 = vmatprep.subr.bf16.mxu0 %v208_v12  ;;  %529 = vmatprep.subr.bf16.mxu1 %v208_v12  ;;  %v543_v23 = vld [vmem:[%s744_s1 + $0x38] sm:$0xff]  }
   0x8   :  { %512 = vmatpush3.bf16.msra.mxu0 %v208_v12  ;;  %530 = vmatpush3.bf16.msra.mxu1 %v208_v12  ;;  %v326_v24 = vld [vmem:[%s746_s3 + $0x18] sm:$0xff] }
   0xa   :  { %346 = vperm.xlu1 %535, %v324_v16   ;;  %341 = vperm.xlu0 %534, %v323_v17  }
   0xb   :  { %514 = vmatmul.mubr.msk.bf16.vlgmr.msra.gmra.mxu0 %vm178_vm2, %v538_v14  ;;  %522 = vmatmul.mubr.msk.bf16.vlgmr.msra.gmra.mxu1 %vm178_vm2, %v539_v15 }
   0xc   :  { %517 = vmatprep.mubr.msk.bf16.mxu0 %vm178_vm2, %v540_v18  ;;  %525 = vmatprep.mubr.msk.bf16.mxu1 %vm178_vm2, %v541_v19 }
   0xe   :  { %351 = vperm.xlu1 %535, %v325_v20   ;;  %80 = vperm.xlu0 %534, %v46_v21  }
  0x13   :  { %518 = vmatmul.mubr.msk.bf16.gmra.mxu0 %vm178_vm2, %v542_v22  ;;  %526 = vmatmul.mubr.msk.bf16.gmra.mxu1 %vm178_vm2, %v543_v23 }
  0x14   :  { %11 = vsyncpa [#allocation4], 0  ;;  %356 = vperm.xlu1 %535, %v326_v24   ;;  %85 = vperm.xlu0 %534, %v47_v25   ;;  %v327_v26 = vld [vmem:[%s746_s3 + $0x20] sm:$0xff]  ;;  %v48_v27 = vld [vmem:[%s745_s2 + $0x30] sm:$0xff]  ;;  %s572_s22 = smov [#allocation3]  }
  0x15   :  { %v328_v28 = vld [vmem:[%s746_s3 + $0x28] sm:$0xff]  ;;  %v49_v29 = vld [vmem:[%s745_s2 + $0x38] sm:$0xff]  ;;  %v329_v30 = vld [vmem:[%s746_s3 + $0x30] sm:$0xff]  ;;  %s478_s23 = sshll.u32 %s572_s22, 4  ;;  %s479_s23 = int_to_ptr.vmem [resolvable:$true] %s478_s23 }
  0x16   :  { %v50_v31 = vld [vmem:[%s745_s2 + $0x40] sm:$0xff]  ;;  %v330_v32 = vld [vmem:[%s746_s3 + $0x38] sm:$0xff]  ;;  %v51_v33 = vld [vmem:[%s745_s2 + $0x48] sm:$0xff]  ;;  %p553_p1 = scmp.lt.s32.totalorder %s479_s23, %s479_s23 }
  0x17   :  { %v331_v34 = vld [vmem:[%s746_s3 + $0x40] sm:$0xff]  ;;  %v52_v35 = vld [vmem:[%s745_s2 + $0x50] sm:$0xff]  ;;  %v332_v36 = vld [vmem:[%s746_s3 + $0x48] sm:$0xff] }
  0x18   :  { %361 = vperm.xlu1 %535, %v327_v26   ;;  %90 = vperm.xlu0 %534, %v48_v27   ;;  %v53_v37 = vld [vmem:[%s745_s2 + $0x58] sm:$0xff]  ;;  %v333_v38 = vld [vmem:[%s746_s3 + $0x50] sm:$0xff]  ;;  %v54_v39 = vld [vmem:[%s745_s2 + $0x60] sm:$0xff] }
  0x19   :  { %v334_v40 = vld [vmem:[%s746_s3 + $0x58] sm:$0xff]  ;;  %v55_v41 = vld [vmem:[%s745_s2 + $0x68] sm:$0xff]  ;;  %v335_v42 = vld [vmem:[%s746_s3 + $0x60] sm:$0xff] }
  0x1a   :  { %v56_v43 = vld [vmem:[%s745_s2 + $0x70] sm:$0xff]  ;;  %v336_v44 = vld [vmem:[%s746_s3 + $0x68] sm:$0xff]  ;;  %v57_v45 = vld [vmem:[%s745_s2 + $0x78] sm:$0xff] }
  0x1b   :  { %v338_v46 = vld [vmem:[%s746_s3 + $0x78] sm:$0xff]  ;;  %v337_v47 = vld [vmem:[%s746_s3 + $0x70] sm:$0xff] }
  0x1c   :  { %366 = vperm.xlu1 %535, %v328_v28   ;;  %95 = vperm.xlu0 %534, %v49_v29  }
  0x20   :  { %371 = vperm.xlu1 %535, %v329_v30   ;;  %100 = vperm.xlu0 %534, %v50_v31  }
  0x24   :  { %376 = vperm.xlu1 %535, %v330_v32   ;;  %105 = vperm.xlu0 %534, %v51_v33  }
  0x28   :  { %381 = vperm.xlu1 %535, %v331_v34   ;;  %110 = vperm.xlu0 %534, %v52_v35  }
  0x2c   :  { %386 = vperm.xlu1 %535, %v332_v36   ;;  %115 = vperm.xlu0 %534, %v53_v37  }
  0x30   :  { %391 = vperm.xlu1 %535, %v333_v38   ;;  %120 = vperm.xlu0 %534, %v54_v39  }
  0x34   :  { %396 = vperm.xlu1 %535, %v334_v40   ;;  %125 = vperm.xlu0 %534, %v55_v41  }
  0x38   :  { %401 = vperm.xlu1 %535, %v335_v42   ;;  %130 = vperm.xlu0 %534, %v56_v43  }
  0x3c   :  { %406 = vperm.xlu1 %535, %v336_v44   ;;  %135 = vperm.xlu0 %534, %v57_v45  }
  0x40   :  { %416 = vperm.xlu1 %535, %v338_v46   ;;  %411 = vperm.xlu0 %534, %v337_v47  }
  0x7d   :  { %v61_v48 = vpop.permute.xlu0 %60  ;;  %v71_v49 = vpop.permute.xlu1 %70 }
  0x81   :  { %v66_v50 = vpop.permute.xlu0 %65  ;;  %v76_v51 = vpop.permute.xlu1 %75 }
  0x85   :  { %v342_v52 = vpop.permute.xlu0 %341  ;;  %v347_v53 = vpop.permute.xlu1 %346 }
  0x89   :  { %v81_v54 = vpop.permute.xlu0 %80  ;;  %v352_v55 = vpop.permute.xlu1 %351 }
  0x8f   :  { %v86_v56 = vpop.permute.xlu0 %85  ;;  %v357_v57 = vpop.permute.xlu1 %356 }
  0x93   :  { %v91_v58 = vpop.permute.xlu0 %90  ;;  %v362_v59 = vpop.permute.xlu1 %361 }
  0x97   :  { %v96_v60 = vpop.permute.xlu0 %95  ;;  %v367_v61 = vpop.permute.xlu1 %366 }
  0x9b   :  { %v101_v62 = vpop.permute.xlu0 %100  ;;  %v372_v63 = vpop.permute.xlu1 %371 }
  0x9f   :  { %v106_v0 = vpop.permute.xlu0 %105  ;;  %v377_v1 = vpop.permute.xlu1 %376 }
  0xa3   :  { %v111_v2 = vpop.permute.xlu0 %110  ;;  %v382_v5 = vpop.permute.xlu1 %381 }
  0xa7   :  { %v116_v11 = vpop.permute.xlu0 %115  ;;  %v387_v14 = vpop.permute.xlu1 %386 }
  0xab   :  { %v121_v23 = vpop.permute.xlu0 %120  ;;  %v392_v33 = vpop.permute.xlu1 %391 }
  0xaf   :  { %v126_v46 = vpop.permute.xlu0 %125 }
  0xcb   :  { %v515_v3 = vpop.f32.mrf.mxu0  ;;  %v523_v4 = vpop.f32.mrf.mxu1 }
  0xcc   :  { %v253_v12 = vadd.f32 %v515_v3, %v71_v49  ;;  %v131_v3 = vpop.permute.xlu0 %130 }
  0xcd   :  { %v244_v6 = vpop.f32.mrf.mxu0  ;;  %v276_v7 = vpop.f32.mrf.mxu1 }
  0xce   :  { %v245_v8 = vadd.f32 %v244_v6, %v61_v48  ;;  %v309_v20 = vmax.f32 %v253_v12, 0.0  ;;  %v277_v40 = vadd.f32 %v276_v7, %v101_v62 }
  0xcf   :  { %v516_v9 = vpop.f32.mrf.mxu0  ;;  %v524_v10 = vpop.f32.mrf.mxu1 }
  0xd0   :  { %v307_v15 = vmax.f32 %v245_v8, 0.0  ;;  %v256_v16 = vadd.f32 %v516_v9, %v76_v51  ;;  %v421_v30 = vmul.f32 %v352_v55, %v309_v20  ;;  %v397_v51 = vpop.permute.xlu1 %396 }
  0xd1   :  { %v247_v13 = vpop.f32.mrf.mxu0  ;;  %v279_v18 = vpop.f32.mrf.mxu1 }
  0xd2   :  { %v248_v17 = vadd.f32 %v247_v13, %v66_v50  ;;  %v419_v24 = vmul.f32 %v342_v52, %v307_v15  ;;  %v310_v25 = vmax.f32 %v256_v16, 0.0  ;;  %v280_v47 = vadd.f32 %v279_v18, %v106_v0 }
  0xd3   :  { %v519_v19 = vpop.f32.mrf.mxu0  ;;  %v527_v27 = vpop.f32.mrf.mxu1 }
  0xd4   :  { %v308_v21 = vmax.f32 %v248_v17, 0.0  ;;  %v269_v32 = vadd.f32 %v519_v19, %v91_v58  ;;  %v422_v36 = vmul.f32 %v357_v57, %v310_v25  ;;  %v288_v58 = vadd.f32 %v524_v10, %v116_v11  ;;  %v402_v0 = vpop.permute.xlu1 %401  ;;  %v136_v17 = vpop.permute.xlu0 %135 }
  0xd5   :  { %v260_v22 = vpop.f32.mrf.mxu0  ;;  %v292_v41 = vpop.f32.mrf.mxu1 }
  0xd6   :  { %v420_v26 = vmul.f32 %v347_v53, %v308_v21  ;;  %v261_v28 = vadd.f32 %v260_v22, %v81_v54  ;;  %v313_v42 = vmax.f32 %v269_v32, 0.0  ;;  %v285_v53 = vadd.f32 %v523_v4, %v111_v2 }
  0xd7   :  { %v520_v29 = vpop.f32.mrf.mxu0  ;;  %v528_v52 = vpop.f32.mrf.mxu1  ;;  %v315_v54 = vmax.f32 %v277_v40, 0.0  ;;  %v293_v8 = vadd.f32 %v292_v41, %v121_v23  ;;  %v318_v12 = vmax.f32 %v288_v58, 0.0  ;;  %v301_v2 = vadd.f32 %v527_v27, %v131_v3 }
  0xd8   :  { %v435_v31 = vadd.f32 %v420_v26, %v419_v24  ;;  %v311_v34 = vmax.f32 %v261_v28, 0.0  ;;  %v272_v38 = vadd.f32 %v520_v29, %v96_v60  ;;  %v425_v55 = vmul.f32 %v372_v63, %v313_v42  ;;  %v407_v19 = vpop.permute.xlu1 %406  ;;  %v412_v25 = vpop.permute.xlu0 %411 }
  0xd9   :  { %v263_v35 = vpop.f32.mrf.mxu0  ;;  %v316_v60 = vmax.f32 %v280_v47, 0.0  ;;  %v295_v6 = vpop.f32.mrf.mxu1  ;;  %v427_v7 = vmul.f32 %v382_v5, %v315_v54  ;;  %v319_v4 = vmax.f32 %v293_v8, 0.0  ;;  %v430_v10 = vmul.f32 %v397_v51, %v318_v12 }
  0xda   :  { %v436_v37 = vadd.f32 %v435_v31, %v421_v30  ;;  %v264_v39 = vadd.f32 %v263_v35, %v86_v56  ;;  %v423_v43 = vmul.f32 %v362_v59, %v311_v34  ;;  %v314_v49 = vmax.f32 %v272_v38, 0.0 }
  0xdb   :  { %v317_v59 = vmax.f32 %v285_v53, 0.0  ;;  %v428_v13 = vmul.f32 %v387_v14, %v316_v60  ;;  %v296_v15 = vadd.f32 %v295_v6, %v126_v46  ;;  %v304_v11 = vadd.f32 %v528_v52, %v136_v17 }
  0xdc   :  { %v437_v44 = vadd.f32 %v436_v37, %v422_v36  ;;  %v312_v45 = vmax.f32 %v264_v39, 0.0  ;;  %v426_v56 = vmul.f32 %v377_v1, %v314_v49  ;;  %v321_v20 = vmax.f32 %v301_v2, 0.0  ;;  %v417_v28 = vpop.permute.xlu1 %416 }
  0xdd   :  { %v429_v16 = vmul.f32 %v392_v33, %v317_v59  ;;  %v320_v1 = vmax.f32 %v296_v15, 0.0  ;;  %v431_v21 = vmul.f32 %v402_v0, %v319_v4  ;;  %v322_v22 = vmax.f32 %v304_v11, 0.0 }
  0xde   :  { %v438_v48 = vadd.f32 %v437_v44, %v423_v43  ;;  %v424_v50 = vmul.f32 %v367_v61, %v312_v45  ;;  %v433_v14 = vmul.f32 %v412_v25, %v321_v20  ;;  %v457_v36 = vstv %s747_s4  ;;  %s548_s4 = scalar_lea.vmem %s479_s23, 32 }
  0xdf   :  { %v432_v23 = vmul.f32 %v407_v19, %v320_v1  ;;  %v434_v29 = vmul.f32 %v417_v28, %v322_v22  ;;  %p549_p0 = scmp.ne.s32.totalorder %s479_s23, %s548_s4  ;;  %p554_p2 = scmp.lt.s32.totalorder %s548_s4, %s548_s4 }
  0xe0   :  { %v439_v57 = vadd.f32 %v438_v48, %v424_v50 }
  0xe1   :  { %p555_p3 = por %p554_p2, %p553_p1 }
  0xe2   :  { %v440_v62 = vadd.f32 %v439_v57, %v425_v55 }
  0xe3   :  { %p556_p4 = pnand %p555_p3, %p549_p0 }
  0xe4   :  { %v441_v9 = vadd.f32 %v440_v62, %v426_v56 }
  0xe6   :  { %v442_v61 = vadd.f32 %v441_v9, %v427_v7 }
  0xe8   :  { %v443_v63 = vadd.f32 %v442_v61, %v428_v13 }
  0xea   :  { %v444_v18 = vadd.f32 %v443_v63, %v429_v16 }
  0xec   :  { %v445_v5 = vadd.f32 %v444_v18, %v430_v10 }
  0xee   :  { %v446_v24 = vadd.f32 %v445_v5, %v431_v21 }
  0xf0   :  { %v447_v26 = vadd.f32 %v446_v24, %v432_v23 }
  0xf2   :  { %v448_v27 = vadd.f32 %v447_v26, %v433_v14 }
  0xf4   :  { %v449_v30 = vadd.f32 %v448_v27, %v434_v29 }
  0xf6   :  { %v450_v31 = vrot.slane %v449_v30, 4 }
  0xf8   :  { %v451_v32 = vadd.f32 %v450_v31, %v449_v30 }
  0xfa   :  { %v452_v33 = vrot.slane %v451_v32, 2 }
  0xfc   :  { %v453_v34 = vadd.f32 %v452_v33, %v451_v32 }
  0xfe   :  { %v454_v35 = vrot.slane %v453_v34, 1 }
 0x100   :  { %v455_v37 = vadd.f32 %v454_v35, %v453_v34 }
 0x102   :  { %v458_v38 = vadd.f32 %v457_v36, %v455_v37 }
 0x104   :  { %v460_v39 = vand.u32 2147483647, %v458_v38  ;;  %v459_v45 = vmax.f32 %v458_v38, 0.0 }
 0x106   :  { %v461_v40 = vsub.f32 0.0, %v460_v39 }
 0x108   :  { %v462_v41 = vmul.f32 1.442695, %v461_v40 }
 0x10a   :  { %544 = vpow2.f32 %v462_v41 }
 0x117   :  { %v545_v42 = vpop.eup %544 }
 0x118   :  { %v464_v43 = vadd.f32 1.0, %v545_v42 }
 0x11a   :  { %546 = vlog2.f32 %v464_v43 }
 0x127   :  { %v547_v44 = vpop.eup %546 }
 0x128   :  { %v466_v46 = vmul.f32 0.6931472, %v547_v44 }
 0x12a   :  { %v467_v47 = vadd.f32 %v466_v46, %v459_v45 }
 0x12c   :  { %v468_v48 = vsub.f32 0.0, %v467_v47  ;;  %v470_v49 = vsub.f32 %v458_v38, %v467_v47 }
 0x12e   :  { %469 = vst [vmem:[#allocation3] sm:$0x1] %v468_v48  ;;  %471 = vst [vmem:[#allocation3 + $0x1] sm:$0x1] %v470_v49 }
 0x12f   :  { %559 = shalt.err (!%p556_p4)
}
 0x130   :  { %481 = dma.vmem_to_hbm [thread:$0]  %s479_s23, 32, %s748_s5, [#allocation4]  }
 0x131   :  { %568 = dma.done.wait [#allocation4], 32  }
 0x132   :  { %569 = vsyncadd [#allocation4], 4294967264 }
 0x133   :  { %485 = vsyncpa [#allocation4], 1 }

</bundles_post_ra>
